<compile_context>
chip_gen: v5e
topology: v5e:2x2
jax: 0.10.0
libtpu: 0.0.40
codegen_flags: <defaults>
</compile_context>

<pallas_src>
import functools
import numpy as np
import jax
import jax.numpy as jnp
from jax import lax
from jax.experimental import pallas as pl
from jax.experimental.pallas import tpu as pltpu


def _round_up(x, m):
    return ((x + m - 1) // m) * m


def _pick_tile(total, candidates):
    for c in candidates:
        if total % c == 0:
            return c
    return total


def _vmem_limit(block_bytes):
    # Double-buffered pipeline blocks + headroom.  Cap chosen to be safe on every
    # generation (128 MiB v5e/v6e, 64 MiB physical on v7x); re-derive for huge tiles.
    est = 2 * int(block_bytes) + (2 << 20)
    return int(min(max(est, 16 << 20), 48 << 20))


# ----------------------------------------------------------------------------
# Kernel A/C: parallel tiled matmul + bias.  Used for (1) folding Embedding+W_ih
# into gi_table and (2) the output Linear over the packed rows.
# Grid is (cols OUTER, rows INNER) so the (K, col_tile) weight tile's block index is
# constant across the inner row sweep and is not re-streamed per row tile.
# ----------------------------------------------------------------------------
def matmul_bias_kernel(x_ref, w_ref, b_ref, y_ref):
    y_ref[...] = (jnp.dot(x_ref[...], w_ref[...],
                          preferred_element_type=jnp.float32)
                  + b_ref[...]).astype(y_ref.dtype)


def matmul_bias_pallas(x, w, b, *, row_tile, col_tile, out_dtype=jnp.float32):
    Np, Kp = x.shape
    Cp = w.shape[1]
    # Note: no K-reduction axis needed while Kp == 128 (this test); add an
    # ('arbitrary', last) K axis + f32 VMEM accumulator for larger hidden sizes.
    grid = (Cp // col_tile, Np // row_tile)
    block_bytes = (row_tile * Kp * x.dtype.itemsize
                   + Kp * col_tile * w.dtype.itemsize
                   + col_tile * b.dtype.itemsize
                   + row_tile * col_tile * jnp.dtype(out_dtype).itemsize)
    return pl.pallas_call(
        matmul_bias_kernel,
        out_shape=jax.ShapeDtypeStruct((Np, Cp), out_dtype),
        grid_spec=pltpu.PrefetchScalarGridSpec(
            num_scalar_prefetch=0,
            grid=grid,
            in_specs=[
                pl.BlockSpec((row_tile, Kp), lambda j, i: (i, 0)),
                pl.BlockSpec((Kp, col_tile), lambda j, i: (0, j)),
                pl.BlockSpec((1, col_tile),  lambda j, i: (0, j)),
            ],
            out_specs=pl.BlockSpec((row_tile, col_tile), lambda j, i: (i, j)),
        ),
        compiler_params=pltpu.CompilerParams(
            dimension_semantics=("parallel", "parallel"),
            vmem_limit_bytes=_vmem_limit(block_bytes)),
    )(x, w, b)


# ----------------------------------------------------------------------------
# Kernel B: GRU recurrence.  One grid step == one chunk of T_CHUNK time steps.
# Per step only ONE matmul (gh = h @ Whh_all); input gates are precomputed.
# ----------------------------------------------------------------------------
def gru_kernel(gi_ref,      # (T_CHUNK, Bp, 3Hp) f32  precomputed emb @ W_ih^T + b_ih
               len_ref,     # (Bp, 1)  int32           sequence lengths (padded rows = 0)
               h0_ref,      # (Bp, Hp) f32             initial hidden
               whh_ref,     # (Hp, 3Hp) bf16           fused W_hh^T  [r|z|n]
               bhh_ref,     # (1, 3Hp) f32
               hseq_ref,    # (T_CHUNK, Bp, Hp) bf16   per-step hidden states (output)
               hcarry_ref,  # (Bp, Hp) f32             running / final hidden (resident)
               *, t_chunk, hp):
    c = pl.program_id(0)

    @pl.when(c == 0)
    def _():
        hcarry_ref[...] = h0_ref[...]

    # Hoisted out of the unrolled loop: one VMEM load each instead of per-step reloads.
    whh = whh_ref[...]                          # (Hp, 3Hp) bf16
    bhh = bhh_ref[...]                          # (1, 3Hp)  f32
    lengths = len_ref[...]                      # (Bp, 1)   int32
    t_base = c * t_chunk

    def step(tc, h):
        gi = gi_ref[tc]                          # (Bp, 3Hp) f32
        gh = jnp.dot(h.astype(jnp.bfloat16), whh,
                     preferred_element_type=jnp.float32) + bhh
        r = jax.nn.sigmoid(gi[:, 0:hp] + gh[:, 0:hp])
        z = jax.nn.sigmoid(gi[:, hp:2 * hp] + gh[:, hp:2 * hp])
        n = jnp.tanh(gi[:, 2 * hp:3 * hp] + r * gh[:, 2 * hp:3 * hp])
        h_new = (1.0 - z) * n + z * h            # (Bp, Hp) f32

        # packed-GRU semantics: finished sequences keep their last hidden state.
        active = (t_base + tc) < lengths         # (Bp, 1) bool
        h_next = jnp.where(active, h_new, h)
        hseq_ref[tc] = h_next.astype(hseq_ref.dtype)   # bf16 writeback
        return h_next

    h_final = lax.fori_loop(0, t_chunk, step, hcarry_ref[...], unroll=True)
    hcarry_ref[...] = h_final


def gru_pallas(gi_tm, lengths_col, h0, whh, bhh, *, t_chunk):
    Tpad, Bp, G3 = gi_tm.shape
    Hp = G3 // 3
    num_chunks = Tpad // t_chunk
    kernel = functools.partial(gru_kernel, t_chunk=t_chunk, hp=Hp)

    block_bytes = (t_chunk * Bp * G3 * 4 + Bp * 4 + Bp * Hp * 4
                   + Hp * G3 * 2 + G3 * 4
                   + t_chunk * Bp * Hp * 2 + Bp * Hp * 4)

    def build(single_buffer_weights):
        # Grid-invariant weights: single-buffer them (halves their VMEM footprint at
        # realistic H, important on v7x's 64 MiB VMEM) with no pipelining loss.
        wkw = dict(pipeline_mode=pl.Buffered(1)) if single_buffer_weights else {}
        grid_spec = pltpu.PrefetchScalarGridSpec(
            num_scalar_prefetch=0,
            grid=(num_chunks,),
            in_specs=[
                pl.BlockSpec((t_chunk, Bp, G3), lambda c: (c, 0, 0)),       # gi chunk
                pl.BlockSpec((Bp, 1),           lambda c: (0, 0)),          # lengths
                pl.BlockSpec((Bp, Hp),          lambda c: (0, 0)),          # h0
                pl.BlockSpec((Hp, G3),          lambda c: (0, 0), **wkw),   # fused W_hh^T
                pl.BlockSpec((1, G3),           lambda c: (0, 0), **wkw),   # b_hh
            ],
            out_specs=[
                pl.BlockSpec((t_chunk, Bp, Hp), lambda c: (c, 0, 0)),       # hidden states
                pl.BlockSpec((Bp, Hp),          lambda c: (0, 0)),          # final hidden
            ],
        )
        return pl.pallas_call(
            kernel,
            out_shape=(jax.ShapeDtypeStruct((Tpad, Bp, Hp), jnp.bfloat16),
                       jax.ShapeDtypeStruct((Bp, Hp), jnp.float32)),
            grid_spec=grid_spec,
            compiler_params=pltpu.CompilerParams(
                dimension_semantics=("arbitrary",),
                vmem_limit_bytes=_vmem_limit(block_bytes)),
        )

    try:
        return build(True)(gi_tm, lengths_col, h0, whh, bhh)
    except Exception:
        # Fallback: this jax build does not accept pipeline_mode on the TPU
        # pallas_call path -> use default (double-buffered) weight specs.
        return build(False)(gi_tm, lengths_col, h0, whh, bhh)


# ----------------------------------------------------------------------------
# DecoderRNN.forward(caption, lengths, hidden)
# ----------------------------------------------------------------------------
def decoder_rnn_forward(params, caption, lengths_np, hidden, *, t_chunk=16):
    B, T = caption.shape
    H = params["W_hh"].shape[1]
    V = params["W_out"].shape[0]

    lengths = np.asarray(lengths_np, dtype=np.int32)
    assert np.all(lengths[:-1] >= lengths[1:]), \
        "lengths must be sorted descending (pack_padded_sequence enforce_sorted=True)"

    Bp = _round_up(B, 16)          # bf16 sublane packing
    Hp = _round_up(H, 128)
    Vp = _round_up(V, 128)
    G3 = 3 * Hp
    t_chunk = max(8, min(t_chunk, _round_up(T, 8)))
    Tpad = _round_up(T, t_chunk)

    # --- Fuse GRU weights into (Hp, 3Hp) [r|z|n], padded per gate -------------
    def fuse_gates(w):                                   # (3H, H) torch layout
        wg = w.reshape(3, H, H)
        cols = [jnp.pad(wg[g].T, ((0, Hp - H), (0, Hp - H))) for g in range(3)]
        return jnp.concatenate(cols, axis=1)             # (Hp, 3Hp)

    def fuse_bias(b):                                    # (3H,)
        bg = b.reshape(3, H)
        cols = [jnp.pad(bg[g], (0, Hp - H)) for g in range(3)]
        return jnp.concatenate(cols).reshape(1, G3)

    wih = fuse_gates(params["W_ih"]).astype(jnp.bfloat16)
    whh = fuse_gates(params["W_hh"]).astype(jnp.bfloat16)
    bih = fuse_bias(params["b_ih"]).astype(jnp.float32)
    bhh = fuse_bias(params["b_hh"]).astype(jnp.float32)

    # --- Kernel A (parallel): fold Embedding + W_ih + b_ih into one table -----
    #     gi_table[v] = embedding[v] @ W_ih^T + b_ih        (V, 3Hp) f32
    # The input GEMM of the recurrence disappears; per token we only gather a row.
    tbl_row_tile = min(256, _round_up(V, 16))
    Vr = _round_up(V, tbl_row_tile)
    emb_tbl = jnp.pad(params["embedding"],
                      ((0, Vr - V), (0, Hp - H))).astype(jnp.bfloat16)
    gi_table = matmul_bias_pallas(
        emb_tbl, wih, bih,
        row_tile=tbl_row_tile,
        col_tile=_pick_tile(G3, (512, 384, 256, 128)),
        out_dtype=jnp.float32)                            # (Vr, 3Hp)

    # --- per-token input-gate gather (XLA glue) + padding to hardware tiles ---
    gi = gi_table[caption]                                # (B, T, 3Hp) f32
    gi_tm = jnp.transpose(gi, (1, 0, 2))                  # (T, B, 3Hp)
    gi_tm = jnp.pad(gi_tm, ((0, Tpad - T), (0, Bp - B), (0, 0)))

    lengths_col = jnp.pad(jnp.asarray(lengths), (0, Bp - B)).reshape(Bp, 1)
    h0 = jnp.pad(hidden[0], ((0, Bp - B), (0, Hp - H))).astype(jnp.float32)

    # --- Kernel B (sequential): GRU recurrence, one matmul per step ------------
    hseq, hfin = gru_pallas(gi_tm, lengths_col, h0, whh, bhh, t_chunk=t_chunk)

    # --- pack_padded_sequence bookkeeping --------------------------------------
    # TODO(synk): index construction needs concrete lengths, so it stays host Python
    # (matches torch pack_padded_sequence .data row ordering: time-major, sorted batch).
    Tmax = int(lengths.max())
    idx_t, idx_b = [], []
    for t in range(Tmax):
        for b in range(B):
            if lengths[b] > t:
                idx_t.append(t)
                idx_b.append(b)
    idx_t = np.asarray(idx_t, dtype=np.int32)
    idx_b = np.asarray(idx_b, dtype=np.int32)
    batch_sizes = np.asarray([(lengths > t).sum() for t in range(Tmax)],
                             dtype=np.int32)
    N = idx_t.shape[0]

    # --- Kernel C (parallel): output Linear over the packed (valid) rows only --
    # (Remaining opt: fuse this gather into the kernel via scalar-prefetched indices.)
    packed_h = hseq[idx_t, idx_b]                         # (N, Hp) bf16 already
    row_tile = min(256, _round_up(N, 16))
    Npad = _round_up(N, row_tile)
    packed_h = jnp.pad(packed_h, ((0, Npad - N), (0, 0)))

    wout = jnp.pad(params["W_out"].T, ((0, Hp - H), (0, Vp - V))).astype(jnp.bfloat16)
    bout = jnp.pad(params["b_out"], (0, Vp - V)).reshape(1, Vp).astype(jnp.float32)

    y = matmul_bias_pallas(packed_h, wout, bout,
                           row_tile=row_tile,
                           col_tile=_pick_tile(Vp, (512, 256, 128)),
                           out_dtype=jnp.float32)

    packed_out = y[:N, :V]
    hidden_out = hfin[:B, :H][None, :, :]
    return packed_out, hidden_out, jnp.asarray(batch_sizes), (idx_t, idx_b)


# ----------------------------------------------------------------------------
# Pure-JAX f32 reference (mirrors torch GRU / Linear semantics) for validation.
# ----------------------------------------------------------------------------
def reference_forward(params, caption, lengths_np, hidden, idx_t, idx_b):
    B, T = caption.shape
    H = params["W_hh"].shape[1]
    emb = params["embedding"][caption]                  # (B, T, H)
    lengths = jnp.asarray(lengths_np, dtype=jnp.int32)

    W_ih, W_hh = params["W_ih"], params["W_hh"]
    b_ih, b_hh = params["b_ih"], params["b_hh"]
    h = hidden[0]
    outs = []
    for t in range(T):
        x = emb[:, t]
        gi = x @ W_ih.T + b_ih
        gh = h @ W_hh.T + b_hh
        ir, iz, inn = gi[:, :H], gi[:, H:2 * H], gi[:, 2 * H:]
        hr, hz, hn = gh[:, :H], gh[:, H:2 * H], gh[:, 2 * H:]
        r = jax.nn.sigmoid(ir + hr)
        z = jax.nn.sigmoid(iz + hz)
        n = jnp.tanh(inn + r * hn)
        h_new = (1.0 - z) * n + z * h
        mask = (t < lengths)[:, None]
        h = jnp.where(mask, h_new, h)
        outs.append(h)
    y_all = jnp.stack(outs, axis=0)                     # (T, B, H)
    packed_h = y_all[idx_t, idx_b]
    packed_out = packed_h @ params["W_out"].T + params["b_out"]
    return packed_out, h[None, :, :]


if __name__ == "__main__":
    B, T, H, V = 3, 8, 32, 20          # batch, max seq len, hidden_size, output_size
    lengths_np = np.array([8, 5, 3], dtype=np.int32)   # sorted descending (pack requirement)

    key = jax.random.PRNGKey(0)
    keys = jax.random.split(key, 9)
    k = 1.0 / np.sqrt(H)
    params = {
        "embedding": jax.random.normal(keys[0], (V, H), jnp.float32),
        "W_ih": jax.random.uniform(keys[1], (3 * H, H), jnp.float32, -k, k),
        "W_hh": jax.random.uniform(keys[2], (3 * H, H), jnp.float32, -k, k),
        "b_ih": jax.random.uniform(keys[3], (3 * H,), jnp.float32, -k, k),
        "b_hh": jax.random.uniform(keys[4], (3 * H,), jnp.float32, -k, k),
        "W_out": jax.random.uniform(keys[5], (V, H), jnp.float32, -k, k),
        "b_out": jax.random.uniform(keys[6], (V,), jnp.float32, -k, k),
    }
    caption = jax.random.randint(keys[7], (B, T), 0, V, dtype=jnp.int32)
    hidden0 = jax.random.normal(keys[8], (1, B, H), jnp.float32)

    out, hid, batch_sizes, (idx_t, idx_b) = decoder_rnn_forward(
        params, caption, lengths_np, hidden0)
    out = jax.block_until_ready(out)
    hid = jax.block_until_ready(hid)

    ref_out, ref_hid = reference_forward(params, caption, lengths_np, hidden0, idx_t, idx_b)
    # Tolerances sized for bf16 MXU operands (f32 accumulation) vs. an f32 reference.
    np.testing.assert_allclose(np.asarray(out), np.asarray(ref_out), rtol=5e-2, atol=3e-2)
    np.testing.assert_allclose(np.asarray(hid), np.asarray(ref_hid), rtol=5e-2, atol=3e-2)
    assert out.shape == (int(lengths_np.sum()), V)
    assert hid.shape == (1, B, H)
    assert batch_sizes.shape == (int(lengths_np.max()),)

    print("KERNEL_OK")
</pallas_src>

<mosaic_0001>
module attributes {stable_mosaic.version = 11 : i64} {
  func.func @matmul_bias_kernel(%arg0: i32, %arg1: i32, %arg2: memref<32x128xbf16, #tpu.memory_space<vmem>>, %arg3: memref<128x384xbf16, #tpu.memory_space<vmem>>, %arg4: memref<1x384xf32, #tpu.memory_space<vmem>>, %arg5: memref<32x384xf32, #tpu.memory_space<vmem>>) attributes {dimension_semantics = [#tpu.dimension_semantics<parallel>, #tpu.dimension_semantics<parallel>], iteration_bounds = array<i64: 1, 1>, scalar_prefetch = 0 : i64, scratch_operands = 0 : i64, tpu.core_type = #tpu.core_type<tc>, window_params = [{transform_indices = @transform_0, window_bounds = array<i64: 32, 128>}, {transform_indices = @transform_1, window_bounds = array<i64: 128, 384>}, {transform_indices = @transform_2, window_bounds = array<i64: 1, 384>}, {transform_indices = @transform_3, window_bounds = array<i64: 32, 384>}]} {
    %c0 = arith.constant 0 : index
    %c0_0 = arith.constant 0 : index
    %0 = vector.load %arg2[%c0, %c0_0] : memref<32x128xbf16, #tpu.memory_space<vmem>>, vector<32x128xbf16>
    %c0_1 = arith.constant 0 : index
    %c0_2 = arith.constant 0 : index
    %1 = vector.load %arg3[%c0_1, %c0_2] : memref<128x384xbf16, #tpu.memory_space<vmem>>, vector<128x384xbf16>
    %cst = arith.constant dense<0.000000e+00> : vector<32x384xf32>
    %2 = tpu.matmul %0, %1, %cst {dimension_numbers = #tpu.dot_dimension_numbers<[1], [0], [0], [1], [0, 0, 1, 1], [], []>} : vector<32x128xbf16>, vector<128x384xbf16>, vector<32x384xf32> -> vector<32x384xf32>
    %c0_3 = arith.constant 0 : index
    %c0_4 = arith.constant 0 : index
    %3 = vector.load %arg4[%c0_3, %c0_4] : memref<1x384xf32, #tpu.memory_space<vmem>>, vector<1x384xf32>
    %4 = vector.broadcast %3 : vector<1x384xf32> to vector<32x384xf32>
    %5 = arith.addf %2, %4 : vector<32x384xf32>
    %c0_5 = arith.constant 0 : index
    %c0_6 = arith.constant 0 : index
    %6 = vector.load %arg5[%c0_5, %c0_6] : memref<32x384xf32, #tpu.memory_space<vmem>>, vector<32x384xf32>
    tpu.vector_store %arg5[%c0_5, %c0_6], %5 {strides = array<i32>} : memref<32x384xf32, #tpu.memory_space<vmem>>, vector<32x384xf32>,
    return
  }
  func.func @transform_0(%arg0: i32, %arg1: i32) -> (i32, i32) {
    %c0_i32 = arith.constant 0 : i32
    %c0_i32_0 = arith.constant 0 : i32
    return %arg1, %c0_i32 : i32, i32
  }
  func.func @transform_1(%arg0: i32, %arg1: i32) -> (i32, i32) {
    %c0_i32 = arith.constant 0 : i32
    %c0_i32_0 = arith.constant 0 : i32
    return %c0_i32, %arg0 : i32, i32
  }
  func.func @transform_2(%arg0: i32, %arg1: i32) -> (i32, i32) {
    %c0_i32 = arith.constant 0 : i32
    %c0_i32_0 = arith.constant 0 : i32
    return %c0_i32, %arg0 : i32, i32
  }
  func.func @transform_3(%arg0: i32, %arg1: i32) -> (i32, i32) {
    %c0_i32 = arith.constant 0 : i32
    return %arg1, %arg0 : i32, i32
  }
}

</mosaic_0001>

<bundles_post_ra>
// kernel: tpu_custom_call.1
= control target key start
LH: loop header
LB: loop body
LE: loop exit
PB: predicated region body
PF: predicated region fallthrough
CT: control target
= control target key end

     0   :  { %8 = vsyncpa [#allocation3], 0  ;;  %s625_s0 = inlined_call_operand.hbm [shape: bf16[32,128], index: 0, kind: input, shape index: {}]   ;;  %s626_s1 = inlined_call_operand.hbm [shape: bf16[128,384], index: 1, kind: input, shape index: {}]   ;;  %s627_s2 = inlined_call_operand.hbm [shape: f32[1,384], index: 2, kind: input, shape index: {}]   ;;  %s628_s3 = inlined_call_operand.hbm [shape: f32[32,384], index: 3, kind: output, shape index: {}]  }
   0x1   :  { %9 = vsyncpa [#allocation6], 0  ;;  %s28_s14 = sshll.u32 %s626_s1, 4  ;;  %s29_s14 = int_to_ptr.hbm [resolvable:$true] %s28_s14 }
   0x2   :  { %10 = vsyncpa [#allocation4], 0  ;;  %s583_s15 = smov [#allocation5]   ;;  %s15_s19 = sshll.u32 %s625_s0, 4  ;;  %s16_s19 = int_to_ptr.hbm [resolvable:$true] %s15_s19 }
   0x3   :  { %s30_s16 = sshll.u32 %s583_s15, 4  ;;  %s584_s20 = smov 192   ;;  %s31_s16 = int_to_ptr.vmem [resolvable:$true] %s30_s16 }
   0x4   :  { %s585_s21 = smov 12   ;;  %s586_s22 = smov [#allocation2]  }
   0x5   :  { %36 = dma.hbm_to_vmem [thread:$0]  %s29_s14, 3072, %s31_s16, [#allocation6], %s584_s20, %s584_s20, %s585_s21  }
   0x6   :  { %s17_s23 = sshll.u32 %s586_s22, 4  ;;  %s587_s24 = smov 64   ;;  %s18_s23 = int_to_ptr.vmem [resolvable:$true] %s17_s23 }
   0x7   :  { %s588_s25 = smov 4   ;;  %s42_s27 = sshll.u32 %s627_s2, 4  ;;  %s43_s27 = int_to_ptr.hbm [resolvable:$true] %s42_s27 }
   0x8   :  { %23 = dma.hbm_to_vmem [thread:$0]  %s16_s19, 256, %s18_s23, [#allocation3], %s587_s24, %s587_s24, %s588_s25  }
   0x9   :  { %s589_s28 = smov [#allocation7]  }
   0xa   :  { %s44_s29 = sshll.u32 %s589_s28, 4  ;;  %s45_s29 = int_to_ptr.vmem [resolvable:$true] %s44_s29 }
   0xb   :  { %47 = dma.hbm_to_vmem [thread:$0]  %s43_s27, 48, %s45_s29, [#allocation6]  }
   0xc   :  { %577 = dma.done.wait [#allocation3], 256  }
   0xd   :  { %578 = vsyncadd [#allocation3], 4294967040 }
   0xe   :  { %579 = dma.done.wait [#allocation6], 3120  }
   0xf   :  { %580 = vsyncadd [#allocation6], 4294964176  ;;  %v460_v0 = vld [vmem:[#allocation5 + $0xac] sm:$0xf]  ;;  %v429_v1 = vld [vmem:[#allocation5 + $0xb4] sm:$0xf0] }
  0x10   :  { %v435_v2 = vld [vmem:[#allocation5 + $0xb0] sm:$0xf]  ;;  %v432_v3 = vor.u32 %v460_v0, %v429_v1  ;;  %v462_v4 = vld [vmem:[#allocation5 + $0xb8] sm:$0xf0]  ;;  %v457_v5 = vld [vmem:[#allocation5 + $0x94] sm:$0xf] }
  0x11   :  { %v417_v6 = vld [vmem:[#allocation5 + $0x9c] sm:$0xf0]  ;;  %v436_v7 = vor.u32 %v462_v4, %v435_v2  ;;  %v423_v8 = vld [vmem:[#allocation5 + $0x98] sm:$0xf]  ;;  %v459_v9 = vld [vmem:[#allocation5 + $0xa0] sm:$0xf0] }
  0x12   :  { %v427_v10 = vld [vmem:[#allocation5 + $0xa8] sm:$0xf]  ;;  %263 = vmatpush.bf16.msra.mxu1 %v432_v3  ;;  %v420_v11 = vor.u32 %v457_v5, %v417_v6  ;;  %v461_v12 = vld [vmem:[#allocation5 + $0xb0] sm:$0xf0]  ;;  %v424_v13 = vor.u32 %v459_v9, %v423_v8  ;;  %v454_v15 = vld [vmem:[#allocation5 + $0x7c] sm:$0xf] }
  0x13   :  { %282 = vmatpush.bf16.msra.mxu2 %v436_v7  ;;  %v428_v14 = vor.u32 %v461_v12, %v427_v10  ;;  %v405_v16 = vld [vmem:[#allocation5 + $0x84] sm:$0xf0]  ;;  %v415_v17 = vld [vmem:[#allocation5 + $0x90] sm:$0xf]  ;;  %v411_v18 = vld [vmem:[#allocation5 + $0x80] sm:$0xf] }
  0x14   :  { %v456_v19 = vld [vmem:[#allocation5 + $0x88] sm:$0xf0]  ;;  %v458_v20 = vld [vmem:[#allocation5 + $0x98] sm:$0xf0]  ;;  %v408_v22 = vor.u32 %v454_v15, %v405_v16  ;;  %v403_v23 = vld [vmem:[#allocation5 + $0x78] sm:$0xf] }
  0x15   :  { %463 = vmatpush.bf16.msra.mxu3 %v428_v14  ;;  %v416_v21 = vor.u32 %v458_v20, %v415_v17  ;;  %244 = vmatpush.bf16.msra.mxu0 %v428_v14  ;;  %v455_v24 = vld [vmem:[#allocation5 + $0x80] sm:$0xf0]  ;;  %v412_v25 = vor.u32 %v456_v19, %v411_v18  ;;  %v393_v27 = vld [vmem:[#allocation5 + $0x6c] sm:$0xf0]  ;;  %v399_v28 = vld [vmem:[#allocation5 + $0x68] sm:$0xf] }
  0x16   :  { %264 = vmatpush.bf16.msra.mxu1 %v420_v11  ;;  %v451_v26 = vld [vmem:[#allocation5 + $0x64] sm:$0xf]  ;;  %v453_v29 = vld [vmem:[#allocation5 + $0x70] sm:$0xf0]  ;;  %v404_v30 = vor.u32 %v455_v24, %v403_v23  ;;  %v391_v32 = vld [vmem:[#allocation5 + $0x60] sm:$0xf] }
  0x17   :  { %283 = vmatpush.bf16.msra.mxu2 %v424_v13  ;;  %v396_v31 = vor.u32 %v451_v26, %v393_v27  ;;  %v452_v33 = vld [vmem:[#allocation5 + $0x68] sm:$0xf0]  ;;  %v400_v34 = vor.u32 %v453_v29, %v399_v28  ;;  %v381_v36 = vld [vmem:[#allocation5 + $0x54] sm:$0xf0]  ;;  %v387_v37 = vld [vmem:[#allocation5 + $0x50] sm:$0xf] }
  0x18   :  { %v448_v35 = vld [vmem:[#allocation5 + $0x4c] sm:$0xf]  ;;  %v450_v38 = vld [vmem:[#allocation5 + $0x58] sm:$0xf0]  ;;  %v392_v39 = vor.u32 %v452_v33, %v391_v32  ;;  %v379_v41 = vld [vmem:[#allocation5 + $0x48] sm:$0xf] }
  0x19   :  { %464 = vmatpush.bf16.msra.mxu3 %v416_v21  ;;  %245 = vmatpush.bf16.msra.mxu0 %v416_v21  ;;  %v384_v40 = vor.u32 %v448_v35, %v381_v36  ;;  %v449_v42 = vld [vmem:[#allocation5 + $0x50] sm:$0xf0]  ;;  %v388_v43 = vor.u32 %v450_v38, %v387_v37  ;;  %v369_v45 = vld [vmem:[#allocation5 + $0x3c] sm:$0xf0]  ;;  %v375_v46 = vld [vmem:[#allocation5 + $0x38] sm:$0xf] }
  0x1a   :  { %265 = vmatpush.bf16.msra.mxu1 %v408_v22  ;;  %v445_v44 = vld [vmem:[#allocation5 + $0x34] sm:$0xf]  ;;  %v447_v47 = vld [vmem:[#allocation5 + $0x40] sm:$0xf0]  ;;  %v380_v48 = vor.u32 %v449_v42, %v379_v41  ;;  %v367_v50 = vld [vmem:[#allocation5 + $0x30] sm:$0xf] }
  0x1b   :  { %284 = vmatpush.bf16.msra.mxu2 %v412_v25  ;;  %v372_v49 = vor.u32 %v445_v44, %v369_v45  ;;  %v446_v51 = vld [vmem:[#allocation5 + $0x38] sm:$0xf0]  ;;  %v376_v52 = vor.u32 %v447_v47, %v375_v46  ;;  %v357_v54 = vld [vmem:[#allocation5 + $0x24] sm:$0xf0]  ;;  %v363_v55 = vld [vmem:[#allocation5 + $0x20] sm:$0xf] }
  0x1c   :  { %v442_v53 = vld [vmem:[#allocation5 + $0x1c] sm:$0xf]  ;;  %v444_v56 = vld [vmem:[#allocation5 + $0x28] sm:$0xf0]  ;;  %v368_v57 = vor.u32 %v446_v51, %v367_v50  ;;  %v355_v59 = vld [vmem:[#allocation5 + $0x18] sm:$0xf] }
  0x1d   :  { %465 = vmatpush.bf16.msra.mxu3 %v404_v30  ;;  %246 = vmatpush.bf16.msra.mxu0 %v404_v30  ;;  %v360_v58 = vor.u32 %v442_v53, %v357_v54  ;;  %v443_v60 = vld [vmem:[#allocation5 + $0x20] sm:$0xf0]  ;;  %v364_v61 = vor.u32 %v444_v56, %v363_v55  ;;  %v345_v63 = vld [vmem:[#allocation5 + $0xc] sm:$0xf0]  ;;  %v351_v0 = vld [vmem:[#allocation5 + $0x8] sm:$0xf] }
  0x1e   :  { %266 = vmatpush.bf16.msra.mxu1 %v396_v31  ;;  %v439_v62 = vld [vmem:[#allocation5 + $0x4] sm:$0xf]  ;;  %v441_v1 = vld [vmem:[#allocation5 + $0x10] sm:$0xf0]  ;;  %v356_v2 = vor.u32 %v443_v60, %v355_v59  ;;  %v343_v4 = vld [vmem:[#allocation5] sm:$0xf] }
  0x1f   :  { %285 = vmatpush.bf16.msra.mxu2 %v400_v34  ;;  %v348_v3 = vor.u32 %v439_v62, %v345_v63  ;;  %v440_v5 = vld [vmem:[#allocation5 + $0x8] sm:$0xf0]  ;;  %v352_v6 = vor.u32 %v441_v1, %v351_v0  ;;  %v437_v7 = vld [vmem:[#allocation2] sm:$0xff]  ;;  %v438_v9 = vld [vmem:[#allocation2 + $0x8] sm:$0xff]  ;;  %s590_s0 = smov [#allocation8]   ;;  %s319_s5 = sshll.u32 %s628_s3, 4  ;;  %s320_s5 = int_to_ptr.hbm [resolvable:$true] %s319_s5 }
  0x20   :  { %v344_v8 = vor.u32 %v440_v5, %v343_v4  ;;  %v96_v10 = vld [vmem:[#allocation7] sm:$0x7]  ;;  %s317_s2 = sshll.u32 %s590_s0, 4  ;;  %s591_s6 = smov 384   ;;  %s318_s2 = int_to_ptr.vmem [resolvable:$true] %s317_s2 }
  0x21   :  { %466 = vmatpush.bf16.msra.mxu3 %v392_v39  ;;  %247 = vmatpush.bf16.msra.mxu0 %v392_v39  ;;  %v99_v11 = vperm.slane %v96_v10, 1  ;;  %v98_v14 = vperm.slane %v96_v10, 0  ;;  %v100_v15 = vperm.slane %v96_v10, 2  ;;  %s592_s7 = smov 24  }
  0x22   :  { %267 = vmatpush.bf16.msra.mxu1 %v384_v40 }
  0x23   :  { %286 = vmatpush.bf16.msra.mxu2 %v388_v43 }
  0x25   :  { %467 = vmatpush.bf16.msra.mxu3 %v380_v48  ;;  %248 = vmatpush.bf16.msra.mxu0 %v380_v48 }
  0x26   :  { %268 = vmatpush.bf16.msra.mxu1 %v372_v49 }
  0x27   :  { %287 = vmatpush.bf16.msra.mxu2 %v376_v52 }
  0x29   :  { %468 = vmatpush.bf16.msra.mxu3 %v368_v57  ;;  %249 = vmatpush.bf16.msra.mxu0 %v368_v57 }
  0x2a   :  { %269 = vmatpush.bf16.msra.mxu1 %v360_v58 }
  0x2b   :  { %288 = vmatpush.bf16.msra.mxu2 %v364_v61 }
  0x2d   :  { %469 = vmatpush.bf16.msra.mxu3 %v356_v2  ;;  %250 = vmatpush.bf16.msra.mxu0 %v356_v2 }
  0x2e   :  { %270 = vmatpush.bf16.msra.mxu1 %v348_v3 }
  0x2f   :  { %289 = vmatpush.bf16.msra.mxu2 %v352_v6 }
  0x31   :  { %271 = vmatmul.bf16.vlgmr.msra.gmra.mxu1 %v437_v7  ;;  %470 = vmatpush.bf16.msra.mxu3 %v344_v8 }
  0x32   :  { %290 = vmatmul.bf16.vlgmr.msra.gmra.mxu2 %v437_v7  ;;  %251 = vmatpush.bf16.msra.mxu0 %v344_v8 }
  0x34   :  { %257 = vmatmul.bf16.vlgmr.msra.gmra.mxu3 %v438_v9 }
  0x35   :  { %252 = vmatmul.bf16.vlgmr.msra.gmra.mxu0 %v437_v7 }
  0x41   :  { %276 = vmatmul.bf16.gmra.mxu1 %v438_v9 }
  0x42   :  { %295 = vmatmul.bf16.gmra.mxu2 %v438_v9 }
  0xae   :  { %v272_v12 = vpop.f32.mrf.mxu1 }
  0xaf   :  { %v273_v13 = vadd.f32 %v272_v12, %v99_v11 }
  0xb1   :  { %302 = vst [vmem:[#allocation8 + $0x8] sm:$0xff] %v273_v13 }
  0xb2   :  { %v253_v16 = vpop.f32.mrf.mxu0 }
  0xb3   :  { %v254_v17 = vadd.f32 %v253_v16, %v98_v14 }
  0xb5   :  { %v291_v18 = vpop.f32.mrf.mxu2  ;;  %301 = vst [vmem:[#allocation8] sm:$0xff] %v254_v17 }
  0xb6   :  { %v292_v19 = vadd.f32 %v291_v18, %v100_v15  ;;  %v274_v20 = vpop.f32.mrf.mxu1 }
  0xb7   :  { %v275_v21 = vadd.f32 %v274_v20, %v99_v11  ;;  %v258_v22 = vpop.f32.mrf.mxu3 }
  0xb8   :  { %303 = vst [vmem:[#allocation8 + $0x10] sm:$0xff] %v292_v19  ;;  %v259_v23 = vadd.f32 %v258_v22, %v98_v14 }
  0xb9   :  { %305 = vst [vmem:[#allocation8 + $0x20] sm:$0xff] %v275_v21 }
  0xba   :  { %307 = vst [vmem:[#allocation8 + $0x30] sm:$0xff] %v259_v23  ;;  %v255_v24 = vpop.f32.mrf.mxu0 }
  0xbb   :  { %v256_v25 = vadd.f32 %v255_v24, %v98_v14 }
  0xbd   :  { %v293_v26 = vpop.f32.mrf.mxu2  ;;  %304 = vst [vmem:[#allocation8 + $0x18] sm:$0xff] %v256_v25 }
  0xbe   :  { %v294_v27 = vadd.f32 %v293_v26, %v100_v15  ;;  %v277_v28 = vpop.f32.mrf.mxu1 }
  0xbf   :  { %v278_v29 = vadd.f32 %v277_v28, %v99_v11  ;;  %v260_v30 = vpop.f32.mrf.mxu3 }
  0xc0   :  { %306 = vst [vmem:[#allocation8 + $0x28] sm:$0xff] %v294_v27  ;;  %v261_v31 = vadd.f32 %v260_v30, %v98_v14 }
  0xc1   :  { %308 = vst [vmem:[#allocation8 + $0x38] sm:$0xff] %v278_v29 }
  0xc2   :  { %310 = vst [vmem:[#allocation8 + $0x48] sm:$0xff] %v261_v31 }
  0xc5   :  { %v296_v32 = vpop.f32.mrf.mxu2 }
  0xc6   :  { %v297_v33 = vadd.f32 %v296_v32, %v100_v15  ;;  %v279_v34 = vpop.f32.mrf.mxu1 }
  0xc7   :  { %v280_v35 = vadd.f32 %v279_v34, %v99_v11 }
  0xc8   :  { %309 = vst [vmem:[#allocation8 + $0x40] sm:$0xff] %v297_v33 }
  0xc9   :  { %311 = vst [vmem:[#allocation8 + $0x50] sm:$0xff] %v280_v35 }
  0xcd   :  { %v298_v36 = vpop.f32.mrf.mxu2 }
  0xce   :  { %v299_v37 = vadd.f32 %v298_v36, %v100_v15 }
  0xd0   :  { %312 = vst [vmem:[#allocation8 + $0x58] sm:$0xff] %v299_v37 }
  0xd1   :  { %325 = dma.vmem_to_hbm [thread:$0]  %s318_s2, 1536, %s320_s5, [#allocation4], %s591_s6, %s591_s6, %s592_s7  }
  0xd2   :  { %581 = dma.done.wait [#allocation4], 1536  }
  0xd3   :  { %582 = vsyncadd [#allocation4], 4294965760 }
  0xd4   :  { %330 = vsyncpa [#allocation3], 1 }
  0xd5   :  { %331 = vsyncpa [#allocation6], 1 }
  0xd6   :  { %332 = vsyncpa [#allocation4], 1 }

</bundles_post_ra>
